<compile_context>
chip_gen: v5e
topology: v5e:2x2
jax: 0.10.0
libtpu: 0.0.40
codegen_flags: <defaults>
</compile_context>

<pallas_src>
import math
from functools import partial

import jax
import jax.numpy as jnp
from jax.experimental import pallas as pl
from jax.experimental.pallas import tpu as pltpu

_LANE = 128
_TILE_R_MAX = 1024          # 1024 rows * 128 lanes * 4 B = 512 KiB per block


def _round_up(n, m):
    return ((n + m - 1) // m) * m


def _diffraction_kernel(dose_ref, sigma_ref, bias_ref, x_ref, u_ref, z_ref,
                        o_ref, *, poisson_k):
    """One block: x/u/z are (BB, TILE_R, 128); dose/sigma/bias are (BB, 1, 1)."""
    x = x_ref[...].astype(jnp.float32)
    lam = x * dose_ref[...]                       # broadcast (BB,1,1) -> block

    # ---- Poisson(lam) via CDF inversion with a fixed, unrolled loop ----
    # count = #{ k : u >= CDF(k) }  gives  P(count = k) = pmf(k).
    u = u_ref[...]
    p = jnp.exp(-lam)                             # pmf(0)
    cdf = p
    cnt = (u > cdf).astype(jnp.float32)
    for k in range(1, poisson_k + 1):
        p = p * (lam * (1.0 / float(k)))          # pmf(k) = pmf(k-1) * lam / k
        cdf = cdf + p
        cnt = cnt + (u > cdf).astype(jnp.float32)
    # TODO(synk): for much larger dose ranges add a normal-approximation branch
    #             instead of growing the truncation length.

    # ---- Gaussian noise: scale/shift precomputed standard normals ----
    noise = z_ref[...] * sigma_ref[...] + bias_ref[...]

    o_ref[...] = (cnt + noise).astype(o_ref.dtype)


def diffraction_denoise_residue_transform(x, dose, sigma, bias, noise_key,
                                          *, lam_max=8.0):
    """x: (B, C, H, W) f32; dose/sigma/bias: (B,) f32; noise_key: PRNG key.

    lam_max: static upper bound on (dose * pixel value); sets the Poisson
             truncation length.
    """
    B, C, H, W = x.shape
    N = C * H * W

    # ---- lane-dense layout: (B, R, 128), padded with zeros (Poisson(0)=0) ----
    R0 = (N + _LANE - 1) // _LANE
    if R0 <= _TILE_R_MAX:
        tile_r, R = R0, R0
    else:
        tile_r, R = _TILE_R_MAX, _round_up(R0, _TILE_R_MAX)
    num_row_tiles = R // tile_r

    # Batch blocking: amortize per-step overhead for tiny images.
    if num_row_tiles == 1 and B * R <= _TILE_R_MAX:
        bb = B                                   # whole batch in one block
    else:
        bb = 1
    num_batch_blocks = B // bb                   # bb in {1, B} -> always exact

    xf = x.reshape(B, N).astype(jnp.float32)
    pad = R * _LANE - N
    if pad:
        xf = jnp.pad(xf, ((0, 0), (0, pad)))
    x3 = xf.reshape(B, R, _LANE)

    k_u, k_z = jax.random.split(noise_key)
    u3 = jax.random.uniform(k_u, (B, R, _LANE), dtype=jnp.float32)
    z3 = jax.random.normal(k_z, (B, R, _LANE), dtype=jnp.float32)

    dose3 = dose.astype(jnp.float32).reshape(B, 1, 1)
    sigma3 = sigma.astype(jnp.float32).reshape(B, 1, 1)
    bias3 = bias.astype(jnp.float32).reshape(B, 1, 1)

    # ---- Poisson truncation length from the static lambda bound ----
    lam_max = max(float(lam_max), 1e-3)
    poisson_k = max(8, int(math.ceil(lam_max + 6.0 * math.sqrt(lam_max) + 4.0)))

    img_spec = pl.BlockSpec((bb, tile_r, _LANE), lambda b, t: (b, t, 0))
    scl_spec = pl.BlockSpec((bb, 1, 1), lambda b, t: (b, 0, 0))

    n_elems = B * R * _LANE
    cost = pl.CostEstimate(
        flops=int((5 * poisson_k + 12) * n_elems),
        transcendentals=int(n_elems),
        bytes_accessed=int(16 * n_elems),        # 3 f32 in + 1 f32 out
    )

    out3 = pl.pallas_call(
        partial(_diffraction_kernel, poisson_k=poisson_k),
        out_shape=jax.ShapeDtypeStruct((B, R, _LANE), jnp.float32),
        grid=(num_batch_blocks, num_row_tiles),
        in_specs=[scl_spec, scl_spec, scl_spec, img_spec, img_spec, img_spec],
        out_specs=img_spec,
        compiler_params=pltpu.CompilerParams(
            dimension_semantics=("parallel", "parallel"),
        ),
        cost_estimate=cost,
    )(dose3, sigma3, bias3, x3, u3, z3)

    return out3.reshape(B, R * _LANE)[:, :N].reshape(B, C, H, W)


if __name__ == "__main__":
    key = jax.random.PRNGKey(0)
    B, C, H, W = 2, 4, 16, 16

    # Module __init__ arguments (deterministic, in-script).
    dose_range = (1, 8)
    sigma_range = (0.01, 0.1)
    bias_range = (-0.05, 0.05)

    k_img, k_dose, k_sigma, k_bias, k_noise = jax.random.split(key, 5)

    # Non-negative image (Poisson rate must be >= 0), like normalized intensities.
    x = jax.random.uniform(k_img, (B, C, H, W), dtype=jnp.float32)

    # Per-batch random parameters (shape (B,1,1,1) in torch -> flat (B,) here).
    dose = jax.random.randint(
        k_dose, (B,), int(dose_range[0]), int(dose_range[1])
    ).astype(jnp.float32)
    sigma = (
        jax.random.uniform(k_sigma, (B,), dtype=jnp.float32)
        * (sigma_range[1] - sigma_range[0]) + sigma_range[0]
    )
    bias = (
        jax.random.uniform(k_bias, (B,), dtype=jnp.float32)
        * (bias_range[1] - bias_range[0]) + bias_range[0]
    )

    # Static lambda bound: max dose is dose_range[1]-1 (randint high exclusive),
    # pixel values are < 1.
    lam_max = float(dose_range[1] - 1) * 1.0

    out = diffraction_denoise_residue_transform(
        x, dose, sigma, bias, k_noise, lam_max=lam_max)
    out = jax.block_until_ready(out)

    assert out.shape == (B, C, H, W)
    assert out.dtype == jnp.float32
    assert bool(jnp.all(jnp.isfinite(out)))
    print("KERNEL_OK")
</pallas_src>

<mosaic_0001>
module attributes {stable_mosaic.version = 11 : i64} {
  func.func @_diffraction_kernel(%arg0: i32, %arg1: i32, %arg2: memref<2x1x1xf32, #tpu.memory_space<vmem>>, %arg3: memref<2x1x1xf32, #tpu.memory_space<vmem>>, %arg4: memref<2x1x1xf32, #tpu.memory_space<vmem>>, %arg5: memref<2x8x128xf32, #tpu.memory_space<vmem>>, %arg6: memref<2x8x128xf32, #tpu.memory_space<vmem>>, %arg7: memref<2x8x128xf32, #tpu.memory_space<vmem>>, %arg8: memref<2x8x128xf32, #tpu.memory_space<vmem>>) attributes {dimension_semantics = [#tpu.dimension_semantics<parallel>, #tpu.dimension_semantics<parallel>], iteration_bounds = array<i64: 1, 1>, scalar_prefetch = 0 : i64, scratch_operands = 0 : i64, tpu.core_type = #tpu.core_type<tc>, window_params = [{transform_indices = @transform_0, window_bounds = array<i64: 2, 1, 1>}, {transform_indices = @transform_1, window_bounds = array<i64: 2, 1, 1>}, {transform_indices = @transform_2, window_bounds = array<i64: 2, 1, 1>}, {transform_indices = @transform_3, window_bounds = array<i64: 2, 8, 128>}, {transform_indices = @transform_4, window_bounds = array<i64: 2, 8, 128>}, {transform_indices = @transform_5, window_bounds = array<i64: 2, 8, 128>}, {transform_indices = @transform_6, window_bounds = array<i64: 2, 8, 128>}]} {
    %c0 = arith.constant 0 : index
    %c0_0 = arith.constant 0 : index
    %c0_1 = arith.constant 0 : index
    %0 = vector.load %arg5[%c0, %c0_0, %c0_1] : memref<2x8x128xf32, #tpu.memory_space<vmem>>, vector<2x8x128xf32>
    %c0_2 = arith.constant 0 : index
    %c0_3 = arith.constant 0 : index
    %c0_4 = arith.constant 0 : index
    %1 = vector.load %arg2[%c0_2, %c0_3, %c0_4] : memref<2x1x1xf32, #tpu.memory_space<vmem>>, vector<2x1x1xf32>
    %2 = vector.broadcast %1 : vector<2x1x1xf32> to vector<2x8x128xf32>
    %3 = arith.mulf %0, %2 : vector<2x8x128xf32>
    %c0_5 = arith.constant 0 : index
    %c0_6 = arith.constant 0 : index
    %c0_7 = arith.constant 0 : index
    %4 = vector.load %arg6[%c0_5, %c0_6, %c0_7] : memref<2x8x128xf32, #tpu.memory_space<vmem>>, vector<2x8x128xf32>
    %cst = arith.constant 0.000000e+00 : f32
    %5 = vector.broadcast %cst : f32 to vector<2x8x128xf32>
    %6 = arith.subf %5, %3 : vector<2x8x128xf32>
    %7 = math.exp %6 : vector<2x8x128xf32>
    %8 = arith.cmpf ogt, %4, %7 : vector<2x8x128xf32>
    %9 = arith.extui %8 : vector<2x8x128xi1> to vector<2x8x128xi32>
    %10 = arith.sitofp %9 : vector<2x8x128xi32> to vector<2x8x128xf32>
    %cst_8 = arith.constant 1.000000e+00 : f32
    %11 = vector.broadcast %cst_8 : f32 to vector<2x8x128xf32>
    %12 = arith.mulf %3, %11 : vector<2x8x128xf32>
    %13 = arith.mulf %7, %12 : vector<2x8x128xf32>
    %14 = arith.addf %7, %13 : vector<2x8x128xf32>
    %15 = arith.cmpf ogt, %4, %14 : vector<2x8x128xf32>
    %16 = arith.extui %15 : vector<2x8x128xi1> to vector<2x8x128xi32>
    %17 = arith.sitofp %16 : vector<2x8x128xi32> to vector<2x8x128xf32>
    %18 = arith.addf %10, %17 : vector<2x8x128xf32>
    %cst_9 = arith.constant 5.000000e-01 : f32
    %19 = vector.broadcast %cst_9 : f32 to vector<2x8x128xf32>
    %20 = arith.mulf %3, %19 : vector<2x8x128xf32>
    %21 = arith.mulf %13, %20 : vector<2x8x128xf32>
    %22 = arith.addf %14, %21 : vector<2x8x128xf32>
    %23 = arith.cmpf ogt, %4, %22 : vector<2x8x128xf32>
    %24 = arith.extui %23 : vector<2x8x128xi1> to vector<2x8x128xi32>
    %25 = arith.sitofp %24 : vector<2x8x128xi32> to vector<2x8x128xf32>
    %26 = arith.addf %18, %25 : vector<2x8x128xf32>
    %cst_10 = arith.constant 0.333333343 : f32
    %27 = vector.broadcast %cst_10 : f32 to vector<2x8x128xf32>
    %28 = arith.mulf %3, %27 : vector<2x8x128xf32>
    %29 = arith.mulf %21, %28 : vector<2x8x128xf32>
    %30 = arith.addf %22, %29 : vector<2x8x128xf32>
    %31 = arith.cmpf ogt, %4, %30 : vector<2x8x128xf32>
    %32 = arith.extui %31 : vector<2x8x128xi1> to vector<2x8x128xi32>
    %33 = arith.sitofp %32 : vector<2x8x128xi32> to vector<2x8x128xf32>
    %34 = arith.addf %26, %33 : vector<2x8x128xf32>
    %cst_11 = arith.constant 2.500000e-01 : f32
    %35 = vector.broadcast %cst_11 : f32 to vector<2x8x128xf32>
    %36 = arith.mulf %3, %35 : vector<2x8x128xf32>
    %37 = arith.mulf %29, %36 : vector<2x8x128xf32>
    %38 = arith.addf %30, %37 : vector<2x8x128xf32>
    %39 = arith.cmpf ogt, %4, %38 : vector<2x8x128xf32>
    %40 = arith.extui %39 : vector<2x8x128xi1> to vector<2x8x128xi32>
    %41 = arith.sitofp %40 : vector<2x8x128xi32> to vector<2x8x128xf32>
    %42 = arith.addf %34, %41 : vector<2x8x128xf32>
    %cst_12 = arith.constant 2.000000e-01 : f32
    %43 = vector.broadcast %cst_12 : f32 to vector<2x8x128xf32>
    %44 = arith.mulf %3, %43 : vector<2x8x128xf32>
    %45 = arith.mulf %37, %44 : vector<2x8x128xf32>
    %46 = arith.addf %38, %45 : vector<2x8x128xf32>
    %47 = arith.cmpf ogt, %4, %46 : vector<2x8x128xf32>
    %48 = arith.extui %47 : vector<2x8x128xi1> to vector<2x8x128xi32>
    %49 = arith.sitofp %48 : vector<2x8x128xi32> to vector<2x8x128xf32>
    %50 = arith.addf %42, %49 : vector<2x8x128xf32>
    %cst_13 = arith.constant 0.166666672 : f32
    %51 = vector.broadcast %cst_13 : f32 to vector<2x8x128xf32>
    %52 = arith.mulf %3, %51 : vector<2x8x128xf32>
    %53 = arith.mulf %45, %52 : vector<2x8x128xf32>
    %54 = arith.addf %46, %53 : vector<2x8x128xf32>
    %55 = arith.cmpf ogt, %4, %54 : vector<2x8x128xf32>
    %56 = arith.extui %55 : vector<2x8x128xi1> to vector<2x8x128xi32>
    %57 = arith.sitofp %56 : vector<2x8x128xi32> to vector<2x8x128xf32>
    %58 = arith.addf %50, %57 : vector<2x8x128xf32>
    %cst_14 = arith.constant 0.142857149 : f32
    %59 = vector.broadcast %cst_14 : f32 to vector<2x8x128xf32>
    %60 = arith.mulf %3, %59 : vector<2x8x128xf32>
    %61 = arith.mulf %53, %60 : vector<2x8x128xf32>
    %62 = arith.addf %54, %61 : vector<2x8x128xf32>
    %63 = arith.cmpf ogt, %4, %62 : vector<2x8x128xf32>
    %64 = arith.extui %63 : vector<2x8x128xi1> to vector<2x8x128xi32>
    %65 = arith.sitofp %64 : vector<2x8x128xi32> to vector<2x8x128xf32>
    %66 = arith.addf %58, %65 : vector<2x8x128xf32>
    %cst_15 = arith.constant 1.250000e-01 : f32
    %67 = vector.broadcast %cst_15 : f32 to vector<2x8x128xf32>
    %68 = arith.mulf %3, %67 : vector<2x8x128xf32>
    %69 = arith.mulf %61, %68 : vector<2x8x128xf32>
    %70 = arith.addf %62, %69 : vector<2x8x128xf32>
    %71 = arith.cmpf ogt, %4, %70 : vector<2x8x128xf32>
    %72 = arith.extui %71 : vector<2x8x128xi1> to vector<2x8x128xi32>
    %73 = arith.sitofp %72 : vector<2x8x128xi32> to vector<2x8x128xf32>
    %74 = arith.addf %66, %73 : vector<2x8x128xf32>
    %cst_16 = arith.constant 0.111111112 : f32
    %75 = vector.broadcast %cst_16 : f32 to vector<2x8x128xf32>
    %76 = arith.mulf %3, %75 : vector<2x8x128xf32>
    %77 = arith.mulf %69, %76 : vector<2x8x128xf32>
    %78 = arith.addf %70, %77 : vector<2x8x128xf32>
    %79 = arith.cmpf ogt, %4, %78 : vector<2x8x128xf32>
    %80 = arith.extui %79 : vector<2x8x128xi1> to vector<2x8x128xi32>
    %81 = arith.sitofp %80 : vector<2x8x128xi32> to vector<2x8x128xf32>
    %82 = arith.addf %74, %81 : vector<2x8x128xf32>
    %cst_17 = arith.constant 1.000000e-01 : f32
    %83 = vector.broadcast %cst_17 : f32 to vector<2x8x128xf32>
    %84 = arith.mulf %3, %83 : vector<2x8x128xf32>
    %85 = arith.mulf %77, %84 : vector<2x8x128xf32>
    %86 = arith.addf %78, %85 : vector<2x8x128xf32>
    %87 = arith.cmpf ogt, %4, %86 : vector<2x8x128xf32>
    %88 = arith.extui %87 : vector<2x8x128xi1> to vector<2x8x128xi32>
    %89 = arith.sitofp %88 : vector<2x8x128xi32> to vector<2x8x128xf32>
    %90 = arith.addf %82, %89 : vector<2x8x128xf32>
    %cst_18 = arith.constant 0.0909090936 : f32
    %91 = vector.broadcast %cst_18 : f32 to vector<2x8x128xf32>
    %92 = arith.mulf %3, %91 : vector<2x8x128xf32>
    %93 = arith.mulf %85, %92 : vector<2x8x128xf32>
    %94 = arith.addf %86, %93 : vector<2x8x128xf32>
    %95 = arith.cmpf ogt, %4, %94 : vector<2x8x128xf32>
    %96 = arith.extui %95 : vector<2x8x128xi1> to vector<2x8x128xi32>
    %97 = arith.sitofp %96 : vector<2x8x128xi32> to vector<2x8x128xf32>
    %98 = arith.addf %90, %97 : vector<2x8x128xf32>
    %cst_19 = arith.constant 0.0833333358 : f32
    %99 = vector.broadcast %cst_19 : f32 to vector<2x8x128xf32>
    %100 = arith.mulf %3, %99 : vector<2x8x128xf32>
    %101 = arith.mulf %93, %100 : vector<2x8x128xf32>
    %102 = arith.addf %94, %101 : vector<2x8x128xf32>
    %103 = arith.cmpf ogt, %4, %102 : vector<2x8x128xf32>
    %104 = arith.extui %103 : vector<2x8x128xi1> to vector<2x8x128xi32>
    %105 = arith.sitofp %104 : vector<2x8x128xi32> to vector<2x8x128xf32>
    %106 = arith.addf %98, %105 : vector<2x8x128xf32>
    %cst_20 = arith.constant 0.0769230798 : f32
    %107 = vector.broadcast %cst_20 : f32 to vector<2x8x128xf32>
    %108 = arith.mulf %3, %107 : vector<2x8x128xf32>
    %109 = arith.mulf %101, %108 : vector<2x8x128xf32>
    %110 = arith.addf %102, %109 : vector<2x8x128xf32>
    %111 = arith.cmpf ogt, %4, %110 : vector<2x8x128xf32>
    %112 = arith.extui %111 : vector<2x8x128xi1> to vector<2x8x128xi32>
    %113 = arith.sitofp %112 : vector<2x8x128xi32> to vector<2x8x128xf32>
    %114 = arith.addf %106, %113 : vector<2x8x128xf32>
    %cst_21 = arith.constant 0.0714285746 : f32
    %115 = vector.broadcast %cst_21 : f32 to vector<2x8x128xf32>
    %116 = arith.mulf %3, %115 : vector<2x8x128xf32>
    %117 = arith.mulf %109, %116 : vector<2x8x128xf32>
    %118 = arith.addf %110, %117 : vector<2x8x128xf32>
    %119 = arith.cmpf ogt, %4, %118 : vector<2x8x128xf32>
    %120 = arith.extui %119 : vector<2x8x128xi1> to vector<2x8x128xi32>
    %121 = arith.sitofp %120 : vector<2x8x128xi32> to vector<2x8x128xf32>
    %122 = arith.addf %114, %121 : vector<2x8x128xf32>
    %cst_22 = arith.constant 0.0666666701 : f32
    %123 = vector.broadcast %cst_22 : f32 to vector<2x8x128xf32>
    %124 = arith.mulf %3, %123 : vector<2x8x128xf32>
    %125 = arith.mulf %117, %124 : vector<2x8x128xf32>
    %126 = arith.addf %118, %125 : vector<2x8x128xf32>
    %127 = arith.cmpf ogt, %4, %126 : vector<2x8x128xf32>
    %128 = arith.extui %127 : vector<2x8x128xi1> to vector<2x8x128xi32>
    %129 = arith.sitofp %128 : vector<2x8x128xi32> to vector<2x8x128xf32>
    %130 = arith.addf %122, %129 : vector<2x8x128xf32>
    %cst_23 = arith.constant 6.250000e-02 : f32
    %131 = vector.broadcast %cst_23 : f32 to vector<2x8x128xf32>
    %132 = arith.mulf %3, %131 : vector<2x8x128xf32>
    %133 = arith.mulf %125, %132 : vector<2x8x128xf32>
    %134 = arith.addf %126, %133 : vector<2x8x128xf32>
    %135 = arith.cmpf ogt, %4, %134 : vector<2x8x128xf32>
    %136 = arith.extui %135 : vector<2x8x128xi1> to vector<2x8x128xi32>
    %137 = arith.sitofp %136 : vector<2x8x128xi32> to vector<2x8x128xf32>
    %138 = arith.addf %130, %137 : vector<2x8x128xf32>
    %cst_24 = arith.constant 0.0588235296 : f32
    %139 = vector.broadcast %cst_24 : f32 to vector<2x8x128xf32>
    %140 = arith.mulf %3, %139 : vector<2x8x128xf32>
    %141 = arith.mulf %133, %140 : vector<2x8x128xf32>
    %142 = arith.addf %134, %141 : vector<2x8x128xf32>
    %143 = arith.cmpf ogt, %4, %142 : vector<2x8x128xf32>
    %144 = arith.extui %143 : vector<2x8x128xi1> to vector<2x8x128xi32>
    %145 = arith.sitofp %144 : vector<2x8x128xi32> to vector<2x8x128xf32>
    %146 = arith.addf %138, %145 : vector<2x8x128xf32>
    %cst_25 = arith.constant 0.055555556 : f32
    %147 = vector.broadcast %cst_25 : f32 to vector<2x8x128xf32>
    %148 = arith.mulf %3, %147 : vector<2x8x128xf32>
    %149 = arith.mulf %141, %148 : vector<2x8x128xf32>
    %150 = arith.addf %142, %149 : vector<2x8x128xf32>
    %151 = arith.cmpf ogt, %4, %150 : vector<2x8x128xf32>
    %152 = arith.extui %151 : vector<2x8x128xi1> to vector<2x8x128xi32>
    %153 = arith.sitofp %152 : vector<2x8x128xi32> to vector<2x8x128xf32>
    %154 = arith.addf %146, %153 : vector<2x8x128xf32>
    %cst_26 = arith.constant 0.0526315793 : f32
    %155 = vector.broadcast %cst_26 : f32 to vector<2x8x128xf32>
    %156 = arith.mulf %3, %155 : vector<2x8x128xf32>
    %157 = arith.mulf %149, %156 : vector<2x8x128xf32>
    %158 = arith.addf %150, %157 : vector<2x8x128xf32>
    %159 = arith.cmpf ogt, %4, %158 : vector<2x8x128xf32>
    %160 = arith.extui %159 : vector<2x8x128xi1> to vector<2x8x128xi32>
    %161 = arith.sitofp %160 : vector<2x8x128xi32> to vector<2x8x128xf32>
    %162 = arith.addf %154, %161 : vector<2x8x128xf32>
    %cst_27 = arith.constant 5.000000e-02 : f32
    %163 = vector.broadcast %cst_27 : f32 to vector<2x8x128xf32>
    %164 = arith.mulf %3, %163 : vector<2x8x128xf32>
    %165 = arith.mulf %157, %164 : vector<2x8x128xf32>
    %166 = arith.addf %158, %165 : vector<2x8x128xf32>
    %167 = arith.cmpf ogt, %4, %166 : vector<2x8x128xf32>
    %168 = arith.extui %167 : vector<2x8x128xi1> to vector<2x8x128xi32>
    %169 = arith.sitofp %168 : vector<2x8x128xi32> to vector<2x8x128xf32>
    %170 = arith.addf %162, %169 : vector<2x8x128xf32>
    %cst_28 = arith.constant 0.0476190485 : f32
    %171 = vector.broadcast %cst_28 : f32 to vector<2x8x128xf32>
    %172 = arith.mulf %3, %171 : vector<2x8x128xf32>
    %173 = arith.mulf %165, %172 : vector<2x8x128xf32>
    %174 = arith.addf %166, %173 : vector<2x8x128xf32>
    %175 = arith.cmpf ogt, %4, %174 : vector<2x8x128xf32>
    %176 = arith.extui %175 : vector<2x8x128xi1> to vector<2x8x128xi32>
    %177 = arith.sitofp %176 : vector<2x8x128xi32> to vector<2x8x128xf32>
    %178 = arith.addf %170, %177 : vector<2x8x128xf32>
    %cst_29 = arith.constant 0.0454545468 : f32
    %179 = vector.broadcast %cst_29 : f32 to vector<2x8x128xf32>
    %180 = arith.mulf %3, %179 : vector<2x8x128xf32>
    %181 = arith.mulf %173, %180 : vector<2x8x128xf32>
    %182 = arith.addf %174, %181 : vector<2x8x128xf32>
    %183 = arith.cmpf ogt, %4, %182 : vector<2x8x128xf32>
    %184 = arith.extui %183 : vector<2x8x128xi1> to vector<2x8x128xi32>
    %185 = arith.sitofp %184 : vector<2x8x128xi32> to vector<2x8x128xf32>
    %186 = arith.addf %178, %185 : vector<2x8x128xf32>
    %cst_30 = arith.constant 0.0434782617 : f32
    %187 = vector.broadcast %cst_30 : f32 to vector<2x8x128xf32>
    %188 = arith.mulf %3, %187 : vector<2x8x128xf32>
    %189 = arith.mulf %181, %188 : vector<2x8x128xf32>
    %190 = arith.addf %182, %189 : vector<2x8x128xf32>
    %191 = arith.cmpf ogt, %4, %190 : vector<2x8x128xf32>
    %192 = arith.extui %191 : vector<2x8x128xi1> to vector<2x8x128xi32>
    %193 = arith.sitofp %192 : vector<2x8x128xi32> to vector<2x8x128xf32>
    %194 = arith.addf %186, %193 : vector<2x8x128xf32>
    %cst_31 = arith.constant 0.0416666679 : f32
    %195 = vector.broadcast %cst_31 : f32 to vector<2x8x128xf32>
    %196 = arith.mulf %3, %195 : vector<2x8x128xf32>
    %197 = arith.mulf %189, %196 : vector<2x8x128xf32>
    %198 = arith.addf %190, %197 : vector<2x8x128xf32>
    %199 = arith.cmpf ogt, %4, %198 : vector<2x8x128xf32>
    %200 = arith.extui %199 : vector<2x8x128xi1> to vector<2x8x128xi32>
    %201 = arith.sitofp %200 : vector<2x8x128xi32> to vector<2x8x128xf32>
    %202 = arith.addf %194, %201 : vector<2x8x128xf32>
    %cst_32 = arith.constant 4.000000e-02 : f32
    %203 = vector.broadcast %cst_32 : f32 to vector<2x8x128xf32>
    %204 = arith.mulf %3, %203 : vector<2x8x128xf32>
    %205 = arith.mulf %197, %204 : vector<2x8x128xf32>
    %206 = arith.addf %198, %205 : vector<2x8x128xf32>
    %207 = arith.cmpf ogt, %4, %206 : vector<2x8x128xf32>
    %208 = arith.extui %207 : vector<2x8x128xi1> to vector<2x8x128xi32>
    %209 = arith.sitofp %208 : vector<2x8x128xi32> to vector<2x8x128xf32>
    %210 = arith.addf %202, %209 : vector<2x8x128xf32>
    %cst_33 = arith.constant 0.0384615399 : f32
    %211 = vector.broadcast %cst_33 : f32 to vector<2x8x128xf32>
    %212 = arith.mulf %3, %211 : vector<2x8x128xf32>
    %213 = arith.mulf %205, %212 : vector<2x8x128xf32>
    %214 = arith.addf %206, %213 : vector<2x8x128xf32>
    %215 = arith.cmpf ogt, %4, %214 : vector<2x8x128xf32>
    %216 = arith.extui %215 : vector<2x8x128xi1> to vector<2x8x128xi32>
    %217 = arith.sitofp %216 : vector<2x8x128xi32> to vector<2x8x128xf32>
    %218 = arith.addf %210, %217 : vector<2x8x128xf32>
    %cst_34 = arith.constant 0.0370370373 : f32
    %219 = vector.broadcast %cst_34 : f32 to vector<2x8x128xf32>
    %220 = arith.mulf %3, %219 : vector<2x8x128xf32>
    %221 = arith.mulf %213, %220 : vector<2x8x128xf32>
    %222 = arith.addf %214, %221 : vector<2x8x128xf32>
    %223 = arith.cmpf ogt, %4, %222 : vector<2x8x128xf32>
    %224 = arith.extui %223 : vector<2x8x128xi1> to vector<2x8x128xi32>
    %225 = arith.sitofp %224 : vector<2x8x128xi32> to vector<2x8x128xf32>
    %226 = arith.addf %218, %225 : vector<2x8x128xf32>
    %c0_35 = arith.constant 0 : index
    %c0_36 = arith.constant 0 : index
    %c0_37 = arith.constant 0 : index
    %227 = vector.load %arg7[%c0_35, %c0_36, %c0_37] : memref<2x8x128xf32, #tpu.memory_space<vmem>>, vector<2x8x128xf32>
    %c0_38 = arith.constant 0 : index
    %c0_39 = arith.constant 0 : index
    %c0_40 = arith.constant 0 : index
    %228 = vector.load %arg3[%c0_38, %c0_39, %c0_40] : memref<2x1x1xf32, #tpu.memory_space<vmem>>, vector<2x1x1xf32>
    %229 = vector.broadcast %228 : vector<2x1x1xf32> to vector<2x8x128xf32>
    %230 = arith.mulf %227, %229 : vector<2x8x128xf32>
    %c0_41 = arith.constant 0 : index
    %c0_42 = arith.constant 0 : index
    %c0_43 = arith.constant 0 : index
    %231 = vector.load %arg4[%c0_41, %c0_42, %c0_43] : memref<2x1x1xf32, #tpu.memory_space<vmem>>, vector<2x1x1xf32>
    %232 = vector.broadcast %231 : vector<2x1x1xf32> to vector<2x8x128xf32>
    %233 = arith.addf %230, %232 : vector<2x8x128xf32>
    %234 = arith.addf %226, %233 : vector<2x8x128xf32>
    %c0_44 = arith.constant 0 : index
    %c0_45 = arith.constant 0 : index
    %c0_46 = arith.constant 0 : index
    %235 = vector.load %arg8[%c0_44, %c0_45, %c0_46] : memref<2x8x128xf32, #tpu.memory_space<vmem>>, vector<2x8x128xf32>
    tpu.vector_store %arg8[%c0_44, %c0_45, %c0_46], %234 {strides = array<i32>} : memref<2x8x128xf32, #tpu.memory_space<vmem>>, vector<2x8x128xf32>,
    return
  }
  func.func @transform_0(%arg0: i32, %arg1: i32) -> (i32, i32, i32) {
    %c0_i32 = arith.constant 0 : i32
    %c0_i32_0 = arith.constant 0 : i32
    %c0_i32_1 = arith.constant 0 : i32
    return %arg0, %c0_i32, %c0_i32_0 : i32, i32, i32
  }
  func.func @transform_1(%arg0: i32, %arg1: i32) -> (i32, i32, i32) {
    %c0_i32 = arith.constant 0 : i32
    %c0_i32_0 = arith.constant 0 : i32
    %c0_i32_1 = arith.constant 0 : i32
    return %arg0, %c0_i32, %c0_i32_0 : i32, i32, i32
  }
  func.func @transform_2(%arg0: i32, %arg1: i32) -> (i32, i32, i32) {
    %c0_i32 = arith.constant 0 : i32
    %c0_i32_0 = arith.constant 0 : i32
    %c0_i32_1 = arith.constant 0 : i32
    return %arg0, %c0_i32, %c0_i32_0 : i32, i32, i32
  }
  func.func @transform_3(%arg0: i32, %arg1: i32) -> (i32, i32, i32) {
    %c0_i32 = arith.constant 0 : i32
    %c0_i32_0 = arith.constant 0 : i32
    return %arg0, %arg1, %c0_i32 : i32, i32, i32
  }
  func.func @transform_4(%arg0: i32, %arg1: i32) -> (i32, i32, i32) {
    %c0_i32 = arith.constant 0 : i32
    %c0_i32_0 = arith.constant 0 : i32
    return %arg0, %arg1, %c0_i32 : i32, i32, i32
  }
  func.func @transform_5(%arg0: i32, %arg1: i32) -> (i32, i32, i32) {
    %c0_i32 = arith.constant 0 : i32
    %c0_i32_0 = arith.constant 0 : i32
    return %arg0, %arg1, %c0_i32 : i32, i32, i32
  }
  func.func @transform_6(%arg0: i32, %arg1: i32) -> (i32, i32, i32) {
    %c0_i32 = arith.constant 0 : i32
    %c0_i32_0 = arith.constant 0 : i32
    return %arg0, %arg1, %c0_i32 : i32, i32, i32
  }
}

</mosaic_0001>

<bundles_post_ra>
// kernel: tpu_custom_call.1
= control target key start
LH: loop header
LB: loop body
LE: loop exit
PB: predicated region body
PF: predicated region fallthrough
CT: control target
= control target key end

     0   :  { %11 = vsyncpa [#allocation3], 0  ;;  %s1058_s0 = inlined_call_operand.vmem [shape: f32[2,1,1], index: 0, kind: input, shape index: {}]   ;;  %s1059_s1 = inlined_call_operand.vmem [shape: f32[2,1,1], index: 1, kind: input, shape index: {}]   ;;  %s1060_s2 = inlined_call_operand.vmem [shape: f32[2,1,1], index: 2, kind: input, shape index: {}]   ;;  %s1061_s3 = inlined_call_operand.hbm [shape: f32[2,8,128], index: 3, kind: input, shape index: {}]   ;;  %s1062_s4 = inlined_call_operand.hbm [shape: f32[2,8,128], index: 4, kind: input, shape index: {}]   ;;  %s1063_s5 = inlined_call_operand.hbm [shape: f32[2,8,128], index: 5, kind: input, shape index: {}]   ;;  %s1064_s6 = inlined_call_operand.hbm [shape: f32[2,8,128], index: 6, kind: output, shape index: {}]  }
   0x1   :  { %12 = vsyncpa [#allocation6], 0 }
   0x2   :  { %13 = vsyncpa [#allocation4], 0  ;;  %s37_s23 = sshll.u32 %s1062_s4, 4  ;;  %s716_s24 = smov [#allocation5]   ;;  %s38_s23 = int_to_ptr.hbm [resolvable:$true] %s37_s23 }
   0x3   :  { %s39_s25 = sshll.u32 %s716_s24, 4  ;;  %s24_s28 = sshll.u32 %s1061_s3, 4  ;;  %s40_s25 = int_to_ptr.vmem [resolvable:$true] %s39_s25  ;;  %s25_s28 = int_to_ptr.hbm [resolvable:$true] %s24_s28 }
   0x4   :  { %s717_s29 = smov 128   ;;  %s718_s30 = smov 8  }
   0x5   :  { %45 = dma.hbm_to_vmem [thread:$0]  %s38_s23, 256, %s40_s25, [#allocation6], %s717_s29, %s717_s29, %s718_s30  }
   0x6   :  { %s719_s7 = smov [#allocation2]   ;;  %s50_s4 = sshll.u32 %s1063_s5, 4  ;;  %s51_s4 = int_to_ptr.hbm [resolvable:$true] %s50_s4 }
   0x7   :  { %s26_s8 = sshll.u32 %s719_s7, 4  ;;  %s720_s3 = smov [#allocation7]   ;;  %s27_s8 = int_to_ptr.vmem [resolvable:$true] %s26_s8 }
   0x8   :  { %32 = dma.hbm_to_vmem [thread:$0]  %s25_s28, 256, %s27_s8, [#allocation3], %s717_s29, %s717_s29, %s718_s30  }
   0x9   :  { %s52_s11 = sshll.u32 %s720_s3, 4  ;;  %s53_s11 = int_to_ptr.vmem [resolvable:$true] %s52_s11 }
   0xa   :  { %58 = dma.hbm_to_vmem [thread:$0]  %s51_s4, 256, %s53_s11, [#allocation6], %s717_s29, %s717_s29, %s718_s30  }
   0xb   :  { %710 = dma.done.wait [#allocation3], 256  }
   0xc   :  { %711 = vsyncadd [#allocation3], 4294967040 }
   0xd   :  { %712 = dma.done.wait [#allocation6], 512  }
   0xe   :  { %713 = vsyncadd [#allocation6], 4294966784  ;;  %v721_v0 = vmov 0   ;;  %v604_v1 = vld [vmem:[%s1058_s0] ss:$0 sm:$0xff]  ;;  %v72_v12 = vld [vmem:[#allocation2 + $0x8] sm:$0xff] }
   0xf   :  { %601 = vset.pattern.permute.xlu0 %v721_v0  ;;  %602 = vset.pattern.permute.xlu1 %v721_v0  ;;  %v606_v2 = vld [vmem:[%s1059_s1] ss:$0 sm:$0xff]  ;;  %v605_v4 = vld [vmem:[%s1058_s0 + $0x1] ss:$0 sm:$0xff]  ;;  %v819_v29 = vld [vmem:[#allocation5] sm:$0xff]  ;;  %v722_v60 = vmov 0.0  }
  0x10   :  { %603 = vset.pattern.permute.xlu2 %v721_v0  ;;  %80 = vperm.xlu0 %601, %v604_v1   ;;  %v608_v3 = vld [vmem:[%s1060_s2] ss:$0 sm:$0xff]  ;;  %v607_v5 = vld [vmem:[%s1059_s1 + $0x1] ss:$0 sm:$0xff]  ;;  %s723_s0 = smov [#allocation8]   ;;  %s523_s24 = sshll.u32 %s1064_s6, 4  ;;  %s524_s24 = int_to_ptr.hbm [resolvable:$true] %s523_s24 }
  0x11   :  { %488 = vperm.xlu1 %602, %v606_v2   ;;  %504 = vperm.xlu2 %603, %v608_v3   ;;  %v609_v6 = vld [vmem:[%s1060_s2 + $0x1] ss:$0 sm:$0xff]  ;;  %s521_s1 = sshll.u32 %s723_s0, 4  ;;  %s522_s1 = int_to_ptr.vmem [resolvable:$true] %s521_s1 }
  0x12   :  { %v71_v7 = vld [vmem:[#allocation2] sm:$0xff] }
  0x13   :  { %v479_v34 = vld [vmem:[#allocation7] sm:$0xff] }
  0x18   :  { %84 = vperm.xlu0 %601, %v605_v4   ;;  %v876_v4 = vld [vmem:[#allocation5 + $0x8] sm:$0xff] }
  0x19   :  { %492 = vperm.xlu1 %602, %v607_v5   ;;  %508 = vperm.xlu2 %603, %v609_v6  }
  0x82   :  { %v81_v8 = vpop.permute.xlu0 %80 }
  0x83   :  { %v87_v9 = vmul.f32 %v81_v8, %v71_v7  ;;  %v489_v49 = vpop.permute.xlu1 %488 }
  0x84   :  { %v852_v53 = vmul.f32 %v489_v49, %v479_v34 }
  0x85   :  { %v91_v10 = vsub.f32 0.0, %v87_v9  ;;  %v115_v13 = vmul.f32 0.5, %v87_v9  ;;  %v129_v14 = vmul.f32 0.33333334, %v87_v9  ;;  %v795_v15 = vmul.f32 0.2, %v87_v9 }
  0x86   :  { %v797_v16 = vmul.f32 0.16666667, %v87_v9  ;;  %v143_v18 = vmul.f32 0.25, %v87_v9  ;;  %v799_v19 = vmul.f32 0.14285715, %v87_v9  ;;  %v801_v20 = vmul.f32 0.125, %v87_v9 }
  0x87   :  { %v93_v11 = vmul.f32 1.442695, %v91_v10  ;;  %v803_v21 = vmul.f32 0.11111111, %v87_v9  ;;  %v807_v23 = vmul.f32 0.1, %v87_v9 }
  0x88   :  { %v809_v24 = vmul.f32 0.09090909, %v87_v9  ;;  %v811_v25 = vmul.f32 0.083333336, %v87_v9  ;;  %v813_v26 = vmul.f32 0.07692308, %v87_v9 }
  0x89   :  { %610 = vpow2.f32 %v93_v11  ;;  %v815_v27 = vmul.f32 0.071428575, %v87_v9  ;;  %v817_v28 = vmul.f32 0.06666667, %v87_v9  ;;  %v821_v30 = vmul.f32 0.0625, %v87_v9 }
  0x8a   :  { %v85_v17 = vpop.permute.xlu0 %84  ;;  %v823_v31 = vmul.f32 0.05882353, %v87_v9  ;;  %v825_v32 = vmul.f32 0.055555556, %v87_v9  ;;  %v828_v35 = vmul.f32 0.05263158, %v87_v9 }
  0x8b   :  { %v805_v22 = vmul.f32 %v85_v17, %v72_v12  ;;  %v830_v36 = vmul.f32 0.05, %v87_v9  ;;  %v832_v37 = vmul.f32 0.04761905, %v87_v9  ;;  %v834_v39 = vmul.f32 0.045454547, %v87_v9 }
  0x8c   :  { %v836_v40 = vmul.f32 0.04347826, %v87_v9  ;;  %v838_v43 = vmul.f32 0.041666668, %v87_v9  ;;  %v840_v44 = vmul.f32 0.04, %v87_v9 }
  0x8d   :  { %v92_v33 = vsub.f32 0.0, %v805_v22  ;;  %v842_v45 = vmul.f32 0.03846154, %v87_v9  ;;  %v844_v46 = vmul.f32 0.037037037, %v87_v9  ;;  %v116_v47 = vmul.f32 0.5, %v805_v22 }
  0x8e   :  { %v130_v48 = vmul.f32 0.33333334, %v805_v22  ;;  %v850_v52 = vmul.f32 0.25, %v805_v22  ;;  %v855_v54 = vmul.f32 0.2, %v805_v22  ;;  %v880_v7 = vmul.f32 0.125, %v805_v22 }
  0x8f   :  { %v611_v38 = vpop.eup %610  ;;  %v95_v41 = vmul.f32 1.442695, %v92_v33  ;;  %v858_v55 = vmul.f32 0.16666667, %v805_v22  ;;  %v861_v56 = vmul.f32 0.14285715, %v805_v22 }
  0x90   :  { %v103_v42 = vmul.f32 %v611_v38, %v87_v9  ;;  %vm97_vm0 = vcmp.gt.f32.partialorder %v819_v29, %v611_v38  ;;  %v865_v59 = vmul.f32 0.11111111, %v805_v22  ;;  %v870_v63 = vmul.f32 0.1, %v805_v22 }
  0x91   :  { %612 = vpow2.f32 %v95_v41  ;;  %v537_v61 = vsel %vm97_vm0, 1.0, %v722_v60  ;;  %v873_v0 = vmul.f32 0.09090909, %v805_v22  ;;  %v883_v8 = vmul.f32 0.083333336, %v805_v22 }
  0x92   :  { %v105_v50 = vadd.f32 %v611_v38, %v103_v42  ;;  %v117_v51 = vmul.f32 %v115_v13, %v103_v42  ;;  %v886_v9 = vmul.f32 0.07692308, %v805_v22  ;;  %v894_v17 = vmul.f32 0.071428575, %v805_v22 }
  0x94   :  { %vm107_vm1 = vcmp.gt.f32.partialorder %v819_v29, %v105_v50  ;;  %v119_v57 = vadd.f32 %v117_v51, %v105_v50  ;;  %v131_v58 = vmul.f32 %v129_v14, %v117_v51 }
  0x95   :  { %v539_v62 = vsel %vm107_vm1, 1.0, %v722_v60 }
  0x96   :  { %v113_v1 = vadd.f32 %v539_v62, %v537_v61  ;;  %vm121_vm2 = vcmp.gt.f32.partialorder %v819_v29, %v119_v57  ;;  %v133_v2 = vadd.f32 %v131_v58, %v119_v57  ;;  %v145_v3 = vmul.f32 %v143_v18, %v131_v58 }
  0x97   :  { %v613_v5 = vpop.eup %612  ;;  %v541_v6 = vsel %vm121_vm2, 1.0, %v722_v60 }
  0x98   :  { %v127_v10 = vadd.f32 %v541_v6, %v113_v1  ;;  %vm135_vm3 = vcmp.gt.f32.partialorder %v819_v29, %v133_v2  ;;  %v147_v11 = vadd.f32 %v145_v3, %v133_v2  ;;  %v159_v12 = vmul.f32 %v795_v15, %v145_v3 }
  0x99   :  { %v543_v13 = vsel %vm135_vm3, 1.0, %v722_v60  ;;  %vm98_vm4 = vcmp.gt.f32.partialorder %v876_v4, %v613_v5  ;;  %v104_v14 = vmul.f32 %v613_v5, %v805_v22 }
  0x9a   :  { %v141_v18 = vadd.f32 %v543_v13, %v127_v10  ;;  %vm149_vm5 = vcmp.gt.f32.partialorder %v819_v29, %v147_v11  ;;  %v161_v33 = vadd.f32 %v159_v12, %v147_v11  ;;  %v173_v34 = vmul.f32 %v797_v16, %v159_v12 }
  0x9b   :  { %v545_v38 = vsel %vm149_vm5, 1.0, %v722_v60  ;;  %v538_v41 = vsel %vm98_vm4, 1.0, %v722_v60  ;;  %v106_v15 = vadd.f32 %v613_v5, %v104_v14  ;;  %v118_v42 = vmul.f32 %v116_v47, %v104_v14 }
  0x9c   :  { %v155_v49 = vadd.f32 %v545_v38, %v141_v18  ;;  %vm163_vm6 = vcmp.gt.f32.partialorder %v819_v29, %v161_v33  ;;  %v175_v50 = vadd.f32 %v173_v34, %v161_v33  ;;  %v187_v51 = vmul.f32 %v799_v19, %v173_v34 }
  0x9d   :  { %v547_v57 = vsel %vm163_vm6, 1.0, %v722_v60  ;;  %vm108_vm7 = vcmp.gt.f32.partialorder %v876_v4, %v106_v15  ;;  %v120_v58 = vadd.f32 %v118_v42, %v106_v15  ;;  %v132_v61 = vmul.f32 %v130_v48, %v118_v42 }
  0x9e   :  { %v169_v62 = vadd.f32 %v547_v57, %v155_v49  ;;  %vm177_vm8 = vcmp.gt.f32.partialorder %v819_v29, %v175_v50  ;;  %v189_v16 = vadd.f32 %v187_v51, %v175_v50  ;;  %v201_v1 = vmul.f32 %v801_v20, %v187_v51 }
  0x9f   :  { %v549_v47 = vsel %vm177_vm8, 1.0, %v722_v60  ;;  %v540_v2 = vsel %vm108_vm7, 1.0, %v722_v60  ;;  %vm122_vm9 = vcmp.gt.f32.partialorder %v876_v4, %v120_v58  ;;  %v134_v3 = vadd.f32 %v132_v61, %v120_v58 }
  0xa0   :  { %v183_v19 = vadd.f32 %v549_v47, %v169_v62  ;;  %vm191_vm10 = vcmp.gt.f32.partialorder %v819_v29, %v189_v16  ;;  %v203_v5 = vadd.f32 %v201_v1, %v189_v16  ;;  %v215_v6 = vmul.f32 %v803_v21, %v201_v1 }
  0xa1   :  { %v551_v48 = vsel %vm191_vm10, 1.0, %v722_v60  ;;  %v114_v10 = vadd.f32 %v540_v2, %v538_v41  ;;  %v542_v11 = vsel %vm122_vm9, 1.0, %v722_v60  ;;  %vm136_vm11 = vcmp.gt.f32.partialorder %v876_v4, %v134_v3 }
  0xa2   :  { %v197_v20 = vadd.f32 %v551_v48, %v183_v19  ;;  %vm205_vm12 = vcmp.gt.f32.partialorder %v819_v29, %v203_v5  ;;  %v217_v12 = vadd.f32 %v215_v6, %v203_v5  ;;  %v229_v13 = vmul.f32 %v807_v23, %v215_v6 }
  0xa3   :  { %v553_v14 = vsel %vm205_vm12, 1.0, %v722_v60  ;;  %v128_v18 = vadd.f32 %v542_v11, %v114_v10  ;;  %v544_v33 = vsel %vm136_vm11, 1.0, %v722_v60  ;;  %v146_v21 = vmul.f32 %v850_v52, %v132_v61 }
  0xa4   :  { %v211_v34 = vadd.f32 %v553_v14, %v197_v20  ;;  %vm219_vm13 = vcmp.gt.f32.partialorder %v819_v29, %v217_v12  ;;  %v231_v38 = vadd.f32 %v229_v13, %v217_v12  ;;  %v243_v41 = vmul.f32 %v809_v24, %v229_v13 }
  0xa5   :  { %v555_v15 = vsel %vm219_vm13, 1.0, %v722_v60  ;;  %v142_v42 = vadd.f32 %v544_v33, %v128_v18  ;;  %v148_v49 = vadd.f32 %v146_v21, %v134_v3  ;;  %v160_v50 = vmul.f32 %v855_v54, %v146_v21 }
  0xa6   :  { %v225_v23 = vadd.f32 %v555_v15, %v211_v34  ;;  %vm233_vm14 = vcmp.gt.f32.partialorder %v819_v29, %v231_v38  ;;  %v245_v51 = vadd.f32 %v243_v41, %v231_v38  ;;  %v257_v57 = vmul.f32 %v811_v25, %v243_v41 }
  0xa7   :  { %v557_v52 = vsel %vm233_vm14, 1.0, %v722_v60  ;;  %vm150_vm15 = vcmp.gt.f32.partialorder %v876_v4, %v148_v49  ;;  %v162_v58 = vadd.f32 %v160_v50, %v148_v49  ;;  %v174_v61 = vmul.f32 %v858_v55, %v160_v50 }
  0xa8   :  { %v239_v24 = vadd.f32 %v557_v52, %v225_v23  ;;  %vm247_vm0 = vcmp.gt.f32.partialorder %v819_v29, %v245_v51  ;;  %v259_v62 = vadd.f32 %v257_v57, %v245_v51  ;;  %v271_v16 = vmul.f32 %v813_v26, %v257_v57 }
  0xa9   :  { %v559_v54 = vsel %vm247_vm0, 1.0, %v722_v60  ;;  %v546_v1 = vsel %vm150_vm15, 1.0, %v722_v60  ;;  %vm164_vm1 = vcmp.gt.f32.partialorder %v876_v4, %v162_v58  ;;  %v176_v25 = vadd.f32 %v174_v61, %v162_v58 }
  0xaa   :  { %v253_v47 = vadd.f32 %v559_v54, %v239_v24  ;;  %vm261_vm2 = vcmp.gt.f32.partialorder %v819_v29, %v259_v62  ;;  %v273_v2 = vadd.f32 %v271_v16, %v259_v62  ;;  %v285_v3 = vmul.f32 %v815_v27, %v271_v16 }
  0xab   :  { %v561_v55 = vsel %vm261_vm2, 1.0, %v722_v60  ;;  %v156_v19 = vadd.f32 %v546_v1, %v142_v42  ;;  %v548_v5 = vsel %vm164_vm1, 1.0, %v722_v60  ;;  %v938_v26 = vmul.f32 0.06666667, %v805_v22 }
  0xac   :  { %v267_v6 = vadd.f32 %v561_v55, %v253_v47  ;;  %vm275_vm3 = vcmp.gt.f32.partialorder %v819_v29, %v273_v2  ;;  %v287_v48 = vadd.f32 %v285_v3, %v273_v2  ;;  %v299_v10 = vmul.f32 %v817_v28, %v285_v3 }
  0xad   :  { %v563_v11 = vsel %vm275_vm3, 1.0, %v722_v60  ;;  %v170_v20 = vadd.f32 %v548_v5, %v156_v19  ;;  %vm178_vm4 = vcmp.gt.f32.partialorder %v876_v4, %v176_v25  ;;  %v188_v27 = vmul.f32 %v861_v56, %v174_v61 }
  0xae   :  { %v281_v12 = vadd.f32 %v563_v11, %v267_v6  ;;  %vm289_vm5 = vcmp.gt.f32.partialorder %v819_v29, %v287_v48  ;;  %v301_v13 = vadd.f32 %v299_v10, %v287_v48  ;;  %v313_v14 = vmul.f32 %v821_v30, %v299_v10 }
  0xaf   :  { %v565_v18 = vsel %vm289_vm5, 1.0, %v722_v60  ;;  %v550_v33 = vsel %vm178_vm4, 1.0, %v722_v60  ;;  %v190_v21 = vadd.f32 %v188_v27, %v176_v25  ;;  %v950_v28 = vmul.f32 0.0625, %v805_v22 }
  0xb0   :  { %v295_v34 = vadd.f32 %v565_v18, %v281_v12  ;;  %vm303_vm6 = vcmp.gt.f32.partialorder %v819_v29, %v301_v13  ;;  %v315_v38 = vadd.f32 %v313_v14, %v301_v13  ;;  %v327_v56 = vmul.f32 %v823_v31, %v313_v14 }
  0xb1   :  { %v567_v41 = vsel %vm303_vm6, 1.0, %v722_v60  ;;  %v184_v15 = vadd.f32 %v550_v33, %v170_v20  ;;  %vm192_vm7 = vcmp.gt.f32.partialorder %v876_v4, %v190_v21  ;;  %v202_v30 = vmul.f32 %v880_v7, %v188_v27 }
  0xb2   :  { %v309_v42 = vadd.f32 %v567_v41, %v295_v34  ;;  %vm317_vm8 = vcmp.gt.f32.partialorder %v819_v29, %v315_v38  ;;  %v329_v49 = vadd.f32 %v327_v56, %v315_v38  ;;  %v341_v50 = vmul.f32 %v825_v32, %v327_v56 }
  0xb3   :  { %v569_v23 = vsel %vm317_vm8, 1.0, %v722_v60  ;;  %v552_v51 = vsel %vm192_vm7, 1.0, %v722_v60  ;;  %v204_v57 = vadd.f32 %v202_v30, %v190_v21  ;;  %v216_v31 = vmul.f32 %v865_v59, %v202_v30 }
  0xb4   :  { %v323_v52 = vadd.f32 %v569_v23, %v309_v42  ;;  %vm331_vm9 = vcmp.gt.f32.partialorder %v819_v29, %v329_v49  ;;  %v343_v58 = vadd.f32 %v341_v50, %v329_v49  ;;  %v355_v61 = vmul.f32 %v828_v35, %v341_v50 }
  0xb5   :  { %v571_v7 = vsel %vm331_vm9, 1.0, %v722_v60  ;;  %v198_v24 = vadd.f32 %v552_v51, %v184_v15  ;;  %vm206_vm10 = vcmp.gt.f32.partialorder %v876_v4, %v204_v57  ;;  %v218_v62 = vadd.f32 %v216_v31, %v204_v57 }
  0xb6   :  { %v337_v32 = vadd.f32 %v571_v7, %v323_v52  ;;  %vm345_vm11 = vcmp.gt.f32.partialorder %v819_v29, %v343_v58  ;;  %v357_v16 = vadd.f32 %v355_v61, %v343_v58  ;;  %v369_v54 = vmul.f32 %v830_v36, %v355_v61 }
  0xb7   :  { %v573_v59 = vsel %vm345_vm11, 1.0, %v722_v60  ;;  %v554_v1 = vsel %vm206_vm10, 1.0, %v722_v60  ;;  %vm220_vm12 = vcmp.gt.f32.partialorder %v876_v4, %v218_v62  ;;  %v230_v35 = vmul.f32 %v870_v63, %v216_v31 }
  0xb8   :  { %v351_v25 = vadd.f32 %v573_v59, %v337_v32  ;;  %vm359_vm13 = vcmp.gt.f32.partialorder %v819_v29, %v357_v16  ;;  %v371_v47 = vadd.f32 %v369_v54, %v357_v16  ;;  %v383_v2 = vmul.f32 %v832_v37, %v369_v54 }
  0xb9   :  { %v575_v3 = vsel %vm359_vm13, 1.0, %v722_v60  ;;  %v212_v55 = vadd.f32 %v554_v1, %v198_v24  ;;  %v556_v19 = vsel %vm220_vm12, 1.0, %v722_v60  ;;  %v232_v36 = vadd.f32 %v230_v35, %v218_v62  ;;  %v505_v62 = vpop.permute.xlu2 %504 }
  0xba   :  { %v365_v5 = vadd.f32 %v575_v3, %v351_v25  ;;  %vm373_vm14 = vcmp.gt.f32.partialorder %v819_v29, %v371_v47  ;;  %v385_v6 = vadd.f32 %v383_v2, %v371_v47  ;;  %v397_v48 = vmul.f32 %v834_v39, %v383_v2 }
  0xbb   :  { %v577_v63 = vsel %vm373_vm14, 1.0, %v722_v60  ;;  %v226_v10 = vadd.f32 %v556_v19, %v212_v55  ;;  %vm234_vm15 = vcmp.gt.f32.partialorder %v876_v4, %v232_v36  ;;  %v244_v11 = vmul.f32 %v873_v0, %v230_v35 }
  0xbc   :  { %v379_v37 = vadd.f32 %v577_v63, %v365_v5  ;;  %vm387_vm0 = vcmp.gt.f32.partialorder %v819_v29, %v385_v6  ;;  %v399_v20 = vadd.f32 %v397_v48, %v385_v6  ;;  %v411_v27 = vmul.f32 %v836_v40, %v397_v48 }
  0xbd   :  { %v579_v12 = vsel %vm387_vm0, 1.0, %v722_v60  ;;  %v558_v13 = vsel %vm234_vm15, 1.0, %v722_v60  ;;  %v246_v14 = vadd.f32 %v244_v11, %v232_v36  ;;  %v258_v39 = vmul.f32 %v883_v8, %v244_v11 }
  0xbe   :  { %v393_v18 = vadd.f32 %v579_v12, %v379_v37  ;;  %vm401_vm1 = vcmp.gt.f32.partialorder %v819_v29, %v399_v20  ;;  %v413_v33 = vadd.f32 %v411_v27, %v399_v20  ;;  %v425_v21 = vmul.f32 %v838_v43, %v411_v27 }
  0xbf   :  { %v581_v0 = vsel %vm401_vm1, 1.0, %v722_v60  ;;  %v240_v34 = vadd.f32 %v558_v13, %v226_v10  ;;  %vm248_vm2 = vcmp.gt.f32.partialorder %v876_v4, %v246_v14  ;;  %v260_v38 = vadd.f32 %v258_v39, %v246_v14 }
  0xc0   :  { %v407_v40 = vadd.f32 %v581_v0, %v393_v18  ;;  %vm415_vm3 = vcmp.gt.f32.partialorder %v819_v29, %v413_v33  ;;  %v427_v56 = vadd.f32 %v425_v21, %v413_v33  ;;  %v439_v41 = vmul.f32 %v840_v44, %v425_v21 }
  0xc1   :  { %v583_v8 = vsel %vm415_vm3, 1.0, %v722_v60  ;;  %v560_v15 = vsel %vm248_vm2, 1.0, %v722_v60  ;;  %vm262_vm4 = vcmp.gt.f32.partialorder %v876_v4, %v260_v38  ;;  %v272_v43 = vmul.f32 %v886_v9, %v258_v39 }
  0xc2   :  { %v421_v30 = vadd.f32 %v583_v8, %v407_v40  ;;  %vm429_vm5 = vcmp.gt.f32.partialorder %v819_v29, %v427_v56  ;;  %v441_v42 = vadd.f32 %v439_v41, %v427_v56  ;;  %v453_v49 = vmul.f32 %v842_v45, %v439_v41 }
  0xc3   :  { %v585_v50 = vsel %vm429_vm5, 1.0, %v722_v60  ;;  %v254_v23 = vadd.f32 %v560_v15, %v240_v34  ;;  %v562_v51 = vsel %vm262_vm4, 1.0, %v722_v60  ;;  %v274_v44 = vadd.f32 %v272_v43, %v260_v38 }
  0xc4   :  { %v435_v57 = vadd.f32 %v585_v50, %v421_v30  ;;  %vm443_vm6 = vcmp.gt.f32.partialorder %v819_v29, %v441_v42  ;;  %v455_v31 = vadd.f32 %v453_v49, %v441_v42  ;;  %v467_v52 = vmul.f32 %v844_v46, %v453_v49 }
  0xc5   :  { %v587_v9 = vsel %vm443_vm6, 1.0, %v722_v60  ;;  %v268_v58 = vadd.f32 %v562_v51, %v254_v23  ;;  %vm276_vm7 = vcmp.gt.f32.partialorder %v876_v4, %v274_v44  ;;  %v286_v61 = vmul.f32 %v894_v17, %v272_v43 }
  0xc6   :  { %v449_v45 = vadd.f32 %v587_v9, %v435_v57  ;;  %vm457_vm8 = vcmp.gt.f32.partialorder %v819_v29, %v455_v31  ;;  %v469_v7 = vadd.f32 %v467_v52, %v455_v31  ;;  %v564_v24 = vsel %vm276_vm7, 1.0, %v722_v60 }
  0xc7   :  { %v589_v32 = vsel %vm457_vm8, 1.0, %v722_v60  ;;  %v282_v16 = vadd.f32 %v564_v24, %v268_v58  ;;  %v288_v54 = vadd.f32 %v286_v61, %v274_v44  ;;  %v300_v46 = vmul.f32 %v938_v26, %v286_v61 }
  0xc8   :  { %v463_v59 = vadd.f32 %v589_v32, %v449_v45  ;;  %vm471_vm9 = vcmp.gt.f32.partialorder %v819_v29, %v469_v7  ;;  %v511_v1 = vadd.f32 %v505_v62, %v852_v53  ;;  %v326_v17 = vmul.f32 0.05882353, %v805_v22 }
  0xc9   :  { %v591_v35 = vsel %vm471_vm9, 1.0, %v722_v60  ;;  %vm290_vm10 = vcmp.gt.f32.partialorder %v876_v4, %v288_v54  ;;  %v302_v25 = vadd.f32 %v300_v46, %v288_v54  ;;  %v314_v47 = vmul.f32 %v950_v28, %v300_v46  ;;  %v480_v54 = vld [vmem:[#allocation7 + $0x8] sm:$0xff] }
  0xca   :  { %v477_v2 = vadd.f32 %v591_v35, %v463_v59  ;;  %v566_v3 = vsel %vm290_vm10, 1.0, %v722_v60  ;;  %v340_v55 = vmul.f32 0.055555556, %v805_v22  ;;  %v354_v5 = vmul.f32 0.05263158, %v805_v22 }
  0xcb   :  { %v296_v26 = vadd.f32 %v566_v3, %v282_v16  ;;  %vm304_vm11 = vcmp.gt.f32.partialorder %v876_v4, %v302_v25  ;;  %v316_v29 = vadd.f32 %v314_v47, %v302_v25  ;;  %v328_v19 = vmul.f32 %v326_v17, %v314_v47  ;;  %v493_v16 = vpop.permute.xlu1 %492 }
  0xcc   :  { %v513_v53 = vadd.f32 %v511_v1, %v477_v2  ;;  %v568_v36 = vsel %vm304_vm11, 1.0, %v722_v60  ;;  %v368_v10 = vmul.f32 0.05, %v805_v22  ;;  %v382_v12 = vmul.f32 0.04761905, %v805_v22  ;;  %v509_v2 = vpop.permute.xlu2 %508 }
  0xcd   :  { %v310_v6 = vadd.f32 %v568_v36, %v296_v26  ;;  %vm318_vm12 = vcmp.gt.f32.partialorder %v876_v4, %v316_v29  ;;  %v330_v48 = vadd.f32 %v328_v19, %v316_v29  ;;  %v342_v28 = vmul.f32 %v340_v55, %v328_v19 }
  0xce   :  { %515 = vst [vmem:[#allocation8] sm:$0xff] %v513_v53  ;;  %v570_v63 = vsel %vm318_vm12, 1.0, %v722_v60  ;;  %v396_v33 = vmul.f32 0.045454547, %v805_v22  ;;  %v410_v40 = vmul.f32 0.04347826, %v805_v22  ;;  %v496_v25 = vmul.f32 %v493_v16, %v480_v54 }
  0xcf   :  { %v324_v11 = vadd.f32 %v570_v63, %v310_v6  ;;  %vm332_vm13 = vcmp.gt.f32.partialorder %v876_v4, %v330_v48  ;;  %v344_v37 = vadd.f32 %v342_v28, %v330_v48  ;;  %v356_v20 = vmul.f32 %v354_v5, %v342_v28 }
  0xd0   :  { %v572_v27 = vsel %vm332_vm13, 1.0, %v722_v60  ;;  %v424_v43 = vmul.f32 0.041666668, %v805_v22  ;;  %v438_v23 = vmul.f32 0.04, %v805_v22  ;;  %v512_v19 = vadd.f32 %v509_v2, %v496_v25 }
  0xd1   :  { %v338_v13 = vadd.f32 %v572_v27, %v324_v11  ;;  %vm346_vm14 = vcmp.gt.f32.partialorder %v876_v4, %v344_v37  ;;  %v358_v14 = vadd.f32 %v356_v20, %v344_v37  ;;  %v370_v39 = vmul.f32 %v368_v10, %v356_v20 }
  0xd2   :  { %v574_v18 = vsel %vm346_vm14, 1.0, %v722_v60  ;;  %v452_v52 = vmul.f32 0.03846154, %v805_v22  ;;  %v466_v7 = vmul.f32 0.037037037, %v805_v22 }
  0xd3   :  { %v352_v21 = vadd.f32 %v574_v18, %v338_v13  ;;  %vm360_vm15 = vcmp.gt.f32.partialorder %v876_v4, %v358_v14  ;;  %v372_v0 = vadd.f32 %v370_v39, %v358_v14  ;;  %v384_v34 = vmul.f32 %v382_v12, %v370_v39 }
  0xd4   :  { %v576_v38 = vsel %vm360_vm15, 1.0, %v722_v60 }
  0xd5   :  { %v366_v56 = vadd.f32 %v576_v38, %v352_v21  ;;  %vm374_vm0 = vcmp.gt.f32.partialorder %v876_v4, %v372_v0  ;;  %v386_v41 = vadd.f32 %v384_v34, %v372_v0  ;;  %v398_v8 = vmul.f32 %v396_v33, %v384_v34 }
  0xd6   :  { %v578_v15 = vsel %vm374_vm0, 1.0, %v722_v60 }
  0xd7   :  { %v380_v30 = vadd.f32 %v578_v15, %v366_v56  ;;  %vm388_vm1 = vcmp.gt.f32.partialorder %v876_v4, %v386_v41  ;;  %v400_v42 = vadd.f32 %v398_v8, %v386_v41  ;;  %v412_v49 = vmul.f32 %v410_v40, %v398_v8 }
  0xd8   :  { %v580_v50 = vsel %vm388_vm1, 1.0, %v722_v60 }
  0xd9   :  { %v394_v51 = vadd.f32 %v580_v50, %v380_v30  ;;  %vm402_vm2 = vcmp.gt.f32.partialorder %v876_v4, %v400_v42  ;;  %v414_v44 = vadd.f32 %v412_v49, %v400_v42  ;;  %v426_v57 = vmul.f32 %v424_v43, %v412_v49 }
  0xda   :  { %v582_v31 = vsel %vm402_vm2, 1.0, %v722_v60 }
  0xdb   :  { %v408_v9 = vadd.f32 %v582_v31, %v394_v51  ;;  %vm416_vm3 = vcmp.gt.f32.partialorder %v876_v4, %v414_v44  ;;  %v428_v58 = vadd.f32 %v426_v57, %v414_v44  ;;  %v440_v61 = vmul.f32 %v438_v23, %v426_v57 }
  0xdc   :  { %v584_v45 = vsel %vm416_vm3, 1.0, %v722_v60 }
  0xdd   :  { %v422_v24 = vadd.f32 %v584_v45, %v408_v9  ;;  %vm430_vm4 = vcmp.gt.f32.partialorder %v876_v4, %v428_v58  ;;  %v442_v62 = vadd.f32 %v440_v61, %v428_v58  ;;  %v454_v32 = vmul.f32 %v452_v52, %v440_v61 }
  0xde   :  { %v586_v46 = vsel %vm430_vm4, 1.0, %v722_v60 }
  0xdf   :  { %v436_v59 = vadd.f32 %v586_v46, %v422_v24  ;;  %vm444_vm5 = vcmp.gt.f32.partialorder %v876_v4, %v442_v62  ;;  %v456_v1 = vadd.f32 %v454_v32, %v442_v62  ;;  %v468_v17 = vmul.f32 %v466_v7, %v454_v32 }
  0xe0   :  { %v588_v35 = vsel %vm444_vm5, 1.0, %v722_v60 }
  0xe1   :  { %v450_v47 = vadd.f32 %v588_v35, %v436_v59  ;;  %vm458_vm6 = vcmp.gt.f32.partialorder %v876_v4, %v456_v1  ;;  %v470_v22 = vadd.f32 %v468_v17, %v456_v1 }
  0xe2   :  { %v590_v3 = vsel %vm458_vm6, 1.0, %v722_v60 }
  0xe3   :  { %v464_v55 = vadd.f32 %v590_v3, %v450_v47  ;;  %vm472_vm7 = vcmp.gt.f32.partialorder %v876_v4, %v470_v22 }
  0xe4   :  { %v592_v26 = vsel %vm472_vm7, 1.0, %v722_v60 }
  0xe5   :  { %v478_v29 = vadd.f32 %v592_v26, %v464_v55 }
  0xe7   :  { %v514_v53 = vadd.f32 %v512_v19, %v478_v29 }
  0xe9   :  { %516 = vst [vmem:[#allocation8 + $0x8] sm:$0xff] %v514_v53 }
  0xea   :  { %529 = dma.vmem_to_hbm [thread:$0]  %s522_s1, 256, %s524_s24, [#allocation4], %s717_s29, %s717_s29, %s718_s30  }
  0xeb   :  { %714 = dma.done.wait [#allocation4], 256  }
  0xec   :  { %715 = vsyncadd [#allocation4], 4294967040 }
  0xed   :  { %534 = vsyncpa [#allocation3], 1 }
  0xee   :  { %535 = vsyncpa [#allocation6], 1 }
  0xef   :  { %536 = vsyncpa [#allocation4], 1 }

</bundles_post_ra>
